<compile_context>
chip_gen: v5e
topology: v5e:2x2
jax: 0.10.0
libtpu: 0.0.40
codegen_flags: <defaults>
</compile_context>

<pallas_src>
import math

import jax
import jax.numpy as jnp
from jax.experimental import pallas as pl
from jax.experimental.pallas import tpu as pltpu

_MiB = 1024 * 1024


def make_pos_embedding(emb_size: int, maxlen: int, dtype=jnp.float32):
    """Deterministic sinusoidal table, identical to the PyTorch __init__ buffer."""
    assert emb_size % 2 == 0, "emb_size must be even (the PyTorch module requires it too)"
    den = jnp.exp(-jnp.arange(0, emb_size, 2, dtype=jnp.float32)
                  * math.log(10000.0) / emb_size)              # (emb_size//2,)
    pos = jnp.arange(0, maxlen, dtype=jnp.float32).reshape(maxlen, 1)
    ang = pos * den                                             # (maxlen, emb_size//2)
    pe = jnp.zeros((maxlen, emb_size), dtype=jnp.float32)
    pe = pe.at[:, 0::2].set(jnp.sin(ang))
    pe = pe.at[:, 1::2].set(jnp.cos(ang))
    return pe[:, None, :].astype(dtype)                         # (maxlen, 1, emb_size)


# ----------------------------------------------------------------------------- kernels
def _add2d_kernel(x_ref, pos_ref, o_ref):
    # x_ref, pos_ref, o_ref: (tile_s, B*E) -- fully lane/sublane dense blocks.
    o_ref[...] = x_ref[...] + pos_ref[...]


def _add3d_kernel(x_ref, pos_ref, o_ref):
    # x_ref/o_ref: (tile_s, B, E) with B % 8 == 0; pos_ref: (tile_s, E).
    o_ref[...] = x_ref[...] + pos_ref[...][:, None, :]


# ----------------------------------------------------------------------------- tiling
def _vmem_budget_and_limit():
    """Per-call VMEM block budget + explicit scoped limit, generation-aware."""
    phys = None
    try:
        info = pltpu.get_tpu_info()
        phys = getattr(info, "vmem_capacity_bytes", None)
    except Exception:
        phys = None
    if not phys:
        phys = 64 * _MiB                      # most conservative (v7x per-TC)
    budget = min(24 * _MiB, phys // 2)        # double-buffered blocks live here
    limit = min(phys - 4 * _MiB, budget + 8 * _MiB)   # headroom for Mosaic scratch
    return budget, limit


def _choose_tile_s(S: int, row_bytes: int, budget_bytes: int) -> int:
    """Largest multiple-of-8 seq tile under the VMEM budget.

    Prefers tiles that split S into an even number of equal blocks (balanced
    across v7x's two TensorCores) and avoids a cdiv remainder block when a
    divisor exists.
    """
    max_rows = budget_bytes // (2 * row_bytes)          # x2: double buffering
    max_rows = int(max(8, min(max_rows, S)))
    if S <= 8:
        return S                                        # one full-extent block
    max_rows = max(8, (max_rows // 8) * 8)
    if max_rows >= S:
        half = S // 2
        if S % 2 == 0 and half % 8 == 0:
            return half                                 # 2 equal blocks for 2 TCs
        return S
    best_divisor = None
    for ts in range(max_rows, 7, -8):
        if S % ts == 0:
            if (S // ts) % 2 == 0:
                return ts                               # even # of equal blocks
            if best_divisor is None:
                best_divisor = ts
    if best_divisor is not None:
        return best_divisor
    return max_rows                                     # accept a remainder block


# ----------------------------------------------------------------------------- wrapper
def positional_encoding(token_embedding: jax.Array,
                        pos_embedding: jax.Array,
                        *,
                        tile_s: int | None = None,
                        in_place: bool = False,
                        min_pallas_bytes: int = 4 * _MiB) -> jax.Array:
    """token_embedding: (S, B, E); pos_embedding: (maxlen, 1, E) or (maxlen, E).

    in_place=True adds input_output_aliases={0: 0}; only a win if the caller
    donates token_embedding under jit and never reuses it.
    """
    S, B, E = token_embedding.shape
    dtype = token_embedding.dtype
    maxlen = pos_embedding.shape[0]
    if maxlen < S:
        raise ValueError("maxlen < seq_len")

    # Free 2-D view of the contiguous table; cast ONCE to the activation dtype
    # so Pallas and fallback paths are numerically identical.
    pos2d = pos_embedding.reshape(maxlen, E).astype(dtype)

    use_flat = (B < 8) or (B % 8 != 0)
    lane_ok = ((B * E) % 128 == 0) if use_flat else (E % 128 == 0)
    too_small = token_embedding.size * dtype.itemsize < min_pallas_bytes

    if (not lane_ok) or too_small:
        # Let XLA fuse the elementwise add with its neighbours (embedding scale
        # before, dropout/layernorm after); a standalone kernel cannot win here.
        return token_embedding + pos2d[:S][:, None, :]

    budget, vmem_limit = _vmem_budget_and_limit()
    itemsize = dtype.itemsize

    if use_flat:
        # Dense 2-D problem: x/out/pos are all (S, B*E); reshapes are free views.
        BE = B * E
        x2 = token_embedding.reshape(S, BE)
        # One-time tiled pos table (small: B is small on this path, cacheable
        # / constant-foldable under jit) -> plain dense add, no in-kernel bcast.
        posflat = jnp.tile(pos2d[:S, None, :], (1, B, 1)).reshape(S, BE)

        if tile_s is None:
            row_bytes = 3 * BE * itemsize                 # x-in + out + pos per row
            tile_s = _choose_tile_s(S, row_bytes, budget)
        grid = (pl.cdiv(S, tile_s),)

        out2 = pl.pallas_call(
            _add2d_kernel,
            out_shape=jax.ShapeDtypeStruct((S, BE), dtype),
            grid_spec=pltpu.PrefetchScalarGridSpec(
                num_scalar_prefetch=0,
                grid=grid,
                in_specs=[
                    pl.BlockSpec((tile_s, BE), lambda i: (i, 0)),
                    pl.BlockSpec((tile_s, BE), lambda i: (i, 0)),
                ],
                out_specs=pl.BlockSpec((tile_s, BE), lambda i: (i, 0)),
            ),
            compiler_params=pltpu.CompilerParams(
                dimension_semantics=("parallel",),
                vmem_limit_bytes=vmem_limit),
            input_output_aliases={0: 0} if in_place else {},
        )(x2, posflat)
        return out2.reshape(S, B, E)

    # B >= 8 and B % 8 == 0: keep the 3-D layout (no sublane padding) and a
    # tiny (tile_s, E) pos stream broadcast over the batch axis in-kernel.
    if tile_s is None:
        row_bytes = (2 * B + 1) * E * itemsize            # x-in + out + pos per row
        tile_s = _choose_tile_s(S, row_bytes, budget)
    grid = (pl.cdiv(S, tile_s),)

    return pl.pallas_call(
        _add3d_kernel,
        out_shape=jax.ShapeDtypeStruct((S, B, E), dtype),
        grid_spec=pltpu.PrefetchScalarGridSpec(
            num_scalar_prefetch=0,
            grid=grid,
            in_specs=[
                pl.BlockSpec((tile_s, B, E), lambda i: (i, 0, 0)),
                pl.BlockSpec((tile_s, E), lambda i: (i, 0)),
            ],
            out_specs=pl.BlockSpec((tile_s, B, E), lambda i: (i, 0, 0)),
        ),
        compiler_params=pltpu.CompilerParams(
            dimension_semantics=("parallel",),
            vmem_limit_bytes=vmem_limit),
        input_output_aliases={0: 0} if in_place else {},
    )(token_embedding, pos2d)


if __name__ == "__main__":
    # Small shapes consistent with the module's (seq, batch, emb) forward.
    SEQ, EMB, MAXLEN = 16, 128, 64
    DROPOUT_P = 0.1  # eval-mode dropout -> identity

    key = jax.random.PRNGKey(0)
    pos_emb = make_pos_embedding(EMB, MAXLEN)              # (MAXLEN, 1, EMB)

    # Path 1: small batch (B=2) -> flattened dense 2-D kernel.
    x_small = jax.random.normal(key, (SEQ, 2, EMB), dtype=jnp.float32)
    out_small = positional_encoding(x_small, pos_emb, min_pallas_bytes=0)
    out_small = jax.block_until_ready(out_small)
    ref_small = x_small + pos_emb[:SEQ]
    assert out_small.shape == (SEQ, 2, EMB)
    assert jnp.allclose(out_small, ref_small, atol=1e-6), "mismatch (flattened path)"

    # Path 2: batch multiple of 8 (B=8) -> 3-D layout kernel.
    x_big = jax.random.normal(jax.random.PRNGKey(1), (SEQ, 8, EMB), dtype=jnp.float32)
    out_big = positional_encoding(x_big, pos_emb, min_pallas_bytes=0)
    out_big = jax.block_until_ready(out_big)
    ref_big = x_big + pos_emb[:SEQ]
    assert out_big.shape == (SEQ, 8, EMB)
    assert jnp.allclose(out_big, ref_big, atol=1e-6), "mismatch (3-D path)"

    print("KERNEL_OK")
</pallas_src>

<mosaic_0001>
module attributes {stable_mosaic.version = 11 : i64} {
  func.func @_add2d_kernel(%arg0: i32, %arg1: memref<8x256xf32, #tpu.memory_space<vmem>>, %arg2: memref<8x256xf32, #tpu.memory_space<vmem>>, %arg3: memref<8x256xf32, #tpu.memory_space<vmem>>) attributes {dimension_semantics = [#tpu.dimension_semantics<parallel>], iteration_bounds = array<i64: 2>, scalar_prefetch = 0 : i64, scratch_operands = 0 : i64, tpu.core_type = #tpu.core_type<tc>, window_params = [{transform_indices = @transform_0, window_bounds = array<i64: 8, 256>}, {transform_indices = @transform_1, window_bounds = array<i64: 8, 256>}, {transform_indices = @transform_2, window_bounds = array<i64: 8, 256>}]} {
    %c0 = arith.constant 0 : index
    %c0_0 = arith.constant 0 : index
    %0 = vector.load %arg1[%c0, %c0_0] : memref<8x256xf32, #tpu.memory_space<vmem>>, vector<8x256xf32>
    %c0_1 = arith.constant 0 : index
    %c0_2 = arith.constant 0 : index
    %1 = vector.load %arg2[%c0_1, %c0_2] : memref<8x256xf32, #tpu.memory_space<vmem>>, vector<8x256xf32>
    %2 = arith.addf %0, %1 : vector<8x256xf32>
    %c0_3 = arith.constant 0 : index
    %c0_4 = arith.constant 0 : index
    %3 = vector.load %arg3[%c0_3, %c0_4] : memref<8x256xf32, #tpu.memory_space<vmem>>, vector<8x256xf32>
    tpu.vector_store %arg3[%c0_3, %c0_4], %2 {strides = array<i32>} : memref<8x256xf32, #tpu.memory_space<vmem>>, vector<8x256xf32>,
    return
  }
  func.func @transform_0(%arg0: i32) -> (i32, i32) {
    %c0_i32 = arith.constant 0 : i32
    %c0_i32_0 = arith.constant 0 : i32
    return %arg0, %c0_i32 : i32, i32
  }
  func.func @transform_1(%arg0: i32) -> (i32, i32) {
    %c0_i32 = arith.constant 0 : i32
    %c0_i32_0 = arith.constant 0 : i32
    return %arg0, %c0_i32 : i32, i32
  }
  func.func @transform_2(%arg0: i32) -> (i32, i32) {
    %c0_i32 = arith.constant 0 : i32
    %c0_i32_0 = arith.constant 0 : i32
    return %arg0, %c0_i32 : i32, i32
  }
}

</mosaic_0001>

<bundles_post_ra>
// kernel: tpu_custom_call.1
= control target key start
LH: loop header
LB: loop body
LE: loop exit
PB: predicated region body
PF: predicated region fallthrough
CT: control target
= control target key end

     0   :  { %7 = vsyncpa [#allocation3], 0  ;;  %s699_s0 = inlined_call_operand.hbm [shape: f32[16,256], index: 0, kind: input, shape index: {}]   ;;  %s700_s1 = inlined_call_operand.hbm [shape: f32[16,256], index: 1, kind: input, shape index: {}]   ;;  %s701_s2 = inlined_call_operand.hbm [shape: f32[16,256], index: 2, kind: output, shape index: {}]  }
   0x1   :  { %9 = vsyncpa [#allocation3 + $0x1], 0 }
   0x2   :  { %10 = vsyncpa [#allocation6], 0 }
   0x3   :  { %12 = vsyncpa [#allocation6 + $0x1], 0 }
   0x4   :  { %13 = vsyncpa [#allocation4], 0 }
   0x5   :  { %15 = vsyncpa [#allocation4 + $0x1], 0  ;;  %s539_s9 = smov 0   ;;  %s541_s10 = smov 0  }
   0x6   :  { %s543_s11 = smov 0   ;;  %s545_s12 = smov 0  }
   0x7 LB: > { %s560_s13 = sadd.s32 4294967295, %s522_s12   ;;  %s320_s14 = sadd.s32 4294967294, %s522_s12   ;;  %s522_s12 = sphi %s545_s12, %s712_s12   ;;  %s518_s11 = sphi %s543_s11, %s711_s11   ;;  %s514_s10 = sphi %s541_s10, %s710_s10   ;;  %s510_s9 = sphi %s539_s9, %s709_s9  }
   0x8   : > { %s564_s15 = sadd.s32 1, %s522_s12   ;;  %s28_s16 = sadd.s32 1, %s518_s11 }
   0x9   : > { %s25_s17 = ssub.s32 %s522_s12, %s564_s15  ;;  %p35_p0 = scmp.ne.s32.totalorder %s518_s11, %s514_s10 }
   0xa   : > { %p26_p1 = scmp.eq.s32.totalorder %s25_s17, 0  ;;  %p36_p2 = scmp.eq.s32.totalorder %s522_s12, 0 }
   0xb   : > { %p41_p3 = scmp.ne.s32.totalorder %s514_s10, %s510_s9  ;;  %p42_p4 = scmp.eq.s32.totalorder %s560_s13, 0 }
   0xc   : > { %s576_s18 = scalar_select %p26_p1, %s518_s11, %s28_s16  }
   0xd   : > { %p578_p5 = por %p36_p2, %p35_p0  ;;  %p582_p6 = por %p42_p4, %p41_p3 }
   0xe   : > { %p91_p7 = scmp.eq.s32.totalorder %s560_s13, 1  ;;  %p97_p8 = scmp.eq.s32.totalorder %s320_s14, 1 }
   0xf   : > { %p358_p10 = scmp.lt.s32.totalorder %s522_s12, 2  ;;  %s598_s23 = sand.u32 1, %s518_s11  }
  0x10   : > { %p589_p11 = por %p91_p7, %p35_p0  ;;  %p593_p12 = por %p97_p8, %p41_p3 }
  0x11   : > { %s338_s24 = sshll.u32 %s522_s12, 4  ;;  %s323_s25 = sshll.u32 %s598_s23, 4 }
  0x12   : > { %s126_s28 = scalar_lea.hbm %s699_s0, %s338_s24  ;;  %s121_s30 = scalar_lea.vmem [#allocation2], %s323_s25 }
  0x13   : > { %s128_s29 = sshll.u32 %s126_s28, 4  ;;  %s130_s3 = sshll.u32 %s121_s30, 4  ;;  %s129_s29 = int_to_ptr.hbm [resolvable:$true] %s128_s29  ;;  %s131_s3 = int_to_ptr.vmem [resolvable:$true] %s130_s3 }
  0x14   : > { %p607_p13 = pnand %p358_p10, %p578_p5  ;;  %p329_p0 = scmp.ge.s32.totalorder %s522_s12, 1 }
  0x15   : > { %p155_p1 = scmp.lt.s32.totalorder %s522_s12, 3  ;;  %s118_s5 = scalar_lea.sflag [#allocation3], %s598_s23 }
  0x16   : > { %s392_s6 = sshra.s32 %s129_s29, 4  ;;  %p396_p3 = pneg %p607_p13  ;;  %s393_s6 = int_to_ptr.hbm [resolvable:$true] %s392_s6 }
  0x17   : > { %s394_s7 = scalar_lea.hbm %s393_s6, 16  ;;  %s399_s16 = scalar_lea.hbm %s699_s0, 32 }
  0x18   : > { %p395_p2 = scmp.ne.s32.totalorder %s393_s6, %s394_s7  ;;  %p400_p5 = scmp.lt.s32.totalorder %s393_s6, %s699_s0 }
  0x19   : > { %p401_p8 = scmp.lt.s32.totalorder %s399_s16, %s394_s7 }
  0x1a   : > { %p397_p4 = pnand %p396_p3, %p395_p2 }
  0x1b   : > { %p402_p10 = por %p401_p8, %p400_p5 }
  0x1c   : > { %p398_p7 = pneg %p397_p4 }
  0x1e   : > { %p403_p9 = pnand %p402_p10, %p398_p7 }
  0x20   : > { %406 = shalt.err (!%p403_p9)
}
  0x21   : > { %350 = dma.hbm_to_vmem [thread:$0]  (!%p607_p13), %s129_s29, 256, %s131_s3, %s118_s5  }
  0x22   : > { %p631_p2 = pnand %p329_p0, %p155_p1  ;;  %s146_s30 = scalar_lea.hbm %s700_s1, %s338_s24 }
  0x23   : > { %s148_s6 = sshll.u32 %s146_s30, 4  ;;  %s141_s7 = scalar_lea.vmem [#allocation5], %s323_s25  ;;  %s149_s6 = int_to_ptr.hbm [resolvable:$true] %s148_s6 }
  0x24   : > { %s150_s8 = sshll.u32 %s141_s7, 4  ;;  %s138_s14 = scalar_lea.sflag [#allocation6], %s598_s23  ;;  %s151_s8 = int_to_ptr.vmem [resolvable:$true] %s150_s8 }
  0x25   : > { %s422_s16 = sshra.s32 %s149_s6, 4  ;;  %s429_s5 = scalar_lea.hbm %s700_s1, 32  ;;  %s423_s16 = int_to_ptr.hbm [resolvable:$true] %s422_s16 }
  0x26   : > { %s424_s17 = scalar_lea.hbm %s423_s16, 16  ;;  %p430_p4 = scmp.lt.s32.totalorder %s423_s16, %s700_s1 }
  0x27   : > { %p425_p9 = scmp.ne.s32.totalorder %s423_s16, %s424_s17  ;;  %p431_p7 = scmp.lt.s32.totalorder %s429_s5, %s424_s17 }
  0x29   : > { %p427_p0 = pnand %p425_p9, %p396_p3  ;;  %p432_p5 = por %p431_p7, %p430_p4 }
  0x2b   : > { %p428_p1 = pneg %p427_p0 }
  0x2d   : > { %p433_p8 = pnand %p432_p5, %p428_p1 }
  0x2f   : > { %436 = shalt.err (!%p433_p8)
}
  0x30   : > { %353 = dma.hbm_to_vmem [thread:$0]  (!%p607_p13), %s149_s6, 256, %s151_s8, %s138_s14  }
  0x31   : > { %159 = sbr.rel (%p631_p2) target bundleno = 72 (0x48), region = 28  ;;  %s653_s23 = sand.u32 (!%p631_p2), 1, %s514_s10  }
  0x32   : > { %s330_s25 = sshll.u32 (!%p631_p2), %s653_s23, 4  ;;  %s162_s27 = scalar_lea.sflag (!%p631_p2), [#allocation3], %s653_s23 }
  0x33   : > { %s165_s28 = scalar_lea.vmem (!%p631_p2), [#allocation2], %s330_s25 }
  0x36   : > { %497 = dma.done.wait (%p582_p6), %s162_s27, 256  }
  0x37   : > { %499 = vsyncadd (%p582_p6), %s162_s27, 4294967040  ;;  %s172_s4 = scalar_lea.sflag [#allocation6], %s653_s23  ;;  %s175_s30 = scalar_lea.vmem [#allocation5], %s330_s25 }
  0x38   : > { %501 = dma.done.wait (%p582_p6), %s172_s4, 256  }
  0x39   : > { %503 = vsyncadd (%p582_p6), %s172_s4, 4294967040  ;;  %s340_s26 = sshll.u32 %s560_s13, 4  ;;  %s201_s14 = scalar_lea.vmem [#allocation7], %s330_s25  ;;  %v202_v0 = vld [vmem:[%s165_s28] sm:$0xff]  ;;  %v203_v2 = vld [vmem:[%s165_s28 + $0x8] sm:$0xff] }
  0x3a   : > { %s222_s8 = scalar_lea.hbm %s701_s2, %s340_s26  ;;  %s224_s16 = sshll.u32 %s201_s14, 4  ;;  %v204_v1 = vld [vmem:[%s175_s30] sm:$0xff]  ;;  %v205_v4 = vld [vmem:[%s175_s30 + $0x8] sm:$0xff]  ;;  %s225_s16 = int_to_ptr.vmem [resolvable:$true] %s224_s16 }
  0x3b   : > { %s226_s17 = sshll.u32 %s222_s8, 4  ;;  %v206_v3 = vadd.f32 %v204_v1, %v202_v0  ;;  %v207_v5 = vadd.f32 %v205_v4, %v203_v2  ;;  %s211_s20 = scalar_lea.sflag [#allocation4], %s653_s23  ;;  %s227_s17 = int_to_ptr.hbm [resolvable:$true] %s226_s17 }
  0x3c   : > { %s466_s13 = sshra.s32 %s227_s17, 4  ;;  %s472_s19 = scalar_lea.hbm %s701_s2, 32  ;;  %s467_s13 = int_to_ptr.hbm [resolvable:$true] %s466_s13 }
  0x3d   : > { %208 = vst [vmem:[%s201_s14] sm:$0xff] %v206_v3  ;;  %s468_s29 = scalar_lea.hbm %s467_s13, 16  ;;  %p473_p10 = scmp.lt.s32.totalorder %s467_s13, %s701_s2 }
  0x3e   : > { %209 = vst [vmem:[%s201_s14 + $0x8] sm:$0xff] %v207_v5  ;;  %p469_p6 = scmp.ne.s32.totalorder %s467_s13, %s468_s29  ;;  %p474_p2 = scmp.lt.s32.totalorder %s472_s19, %s468_s29 }
  0x40   : > { %p470_p13 = pnand %p469_p6, %p589_p11  ;;  %p475_p9 = por %p474_p2, %p473_p10 }
  0x42   : > { %p471_p3 = pneg %p470_p13 }
  0x44   : > { %p476_p0 = pnand %p475_p9, %p471_p3 }
  0x46   : > { %479 = shalt.err (!%p476_p0)
}
  0x47   : > { %345 = dma.vmem_to_hbm [thread:$0]  (%p589_p11), %s225_s16, 256, %s227_s17, %s211_s20  }
  0x48 PF: > { %s238_s23 = sand.u32 1, %s510_s9   ;;  %p708_p1 = scmp.ge.s32.totalorder %s522_s12, 2 }
  0x49   : > { %s239_s27 = scalar_lea.sflag [#allocation4], %s238_s23 }
  0x4a   : > { %p355_p4 = pnand %p708_p1, %p593_p12 }
  0x4c   : > { %p356_p7 = pneg %p355_p4 }
  0x4e   : > { %505 = dma.done.wait (%p356_p7), %s239_s27, 256  }
  0x4f   : > { %507 = vsyncadd (%p356_p7), %s239_s27, 4294967040  ;;  %p18_p5 = scmp.ge.s32.totalorder %s564_s15, 4   ;;  %s709_s9 = smov %s514_s10 }
  0x50   : > { %s710_s10 = smov %s518_s11  ;;  %s711_s11 = smov %s576_s18 }
  0x51   : > { %s712_s12 = smov %s564_s15  ;;  %20 = sbr.rel (!%p18_p5) target bundleno = 7 (0x7), region = 86 }
  0x56   :  { %245 = vsyncpa [#allocation3], 1 }
  0x57   :  { %247 = vsyncpa [#allocation3 + $0x1], 1 }
  0x58   :  { %248 = vsyncpa [#allocation6], 1 }
  0x59   :  { %250 = vsyncpa [#allocation6 + $0x1], 1 }
  0x5a   :  { %251 = vsyncpa [#allocation4], 1 }
  0x5b   :  { %253 = vsyncpa [#allocation4 + $0x1], 1 }

</bundles_post_ra>
